<compile_context>
chip_gen: v5e
topology: v5e:2x2
jax: 0.10.0
libtpu: 0.0.40
codegen_flags: <defaults>
</compile_context>

<pallas_src>
import functools

import jax
import jax.numpy as jnp
from jax.experimental import pallas as pl
from jax.experimental.pallas import tpu as pltpu

_LANES = 128
_SUBLANES = 8
_MAX_TILE_ROWS = 4096  # 4096*128*4 B = 2 MiB per f32 input block


def _log_l2_kernel(p_ref, t_ref, o_ref, *, epsilon, tile_rows, nblocks, steps,
                   last_rows, has_dup):
    c = pl.program_id(0)          # parallel axis (TensorCore split on v7x)
    i = pl.program_id(1)          # sequential reduction axis

    # Zero the resident (8, 128) partial-sum block at the start of each core's sweep.
    @pl.when(i == 0)
    def _():
        o_ref[...] = jnp.zeros_like(o_ref)

    block_idx = c * steps + i

    # Roll-direction-agnostic pair-lane mask, ONE vreg of work per step:
    # after `sq + roll(sq, 1)`, a lane holds re^2 + im^2 of one complex element
    # exactly when the lane rolled into it is its complex partner (lane ^ 1).
    lane_iota = jax.lax.broadcasted_iota(jnp.int32, (_SUBLANES, _LANES), 1)
    rolled_iota = pltpu.roll(lane_iota, 1, 1)
    pair_lane = rolled_iota[:1, :] == (lane_iota[:1, :] ^ 1)   # (1, 128) bool

    def accumulate(mask_rows):
        p = p_ref[...].astype(jnp.float32)     # in-kernel cast: native-dtype stream
        t = t_ref[...].astype(jnp.float32)
        sp = p * p
        st = t * t
        # |p_k|^2 on the pair lanes; |t_k|^2 of the SAME element on the
        # complementary lanes (roll by -1 == 127 mod 128, same primitive
        # direction), so one sqrt + one log below covers both inputs.
        abs2_p = sp + pltpu.roll(sp, 1, 1)
        abs2_t = st + pltpu.roll(st, 127, 1)
        packed = jnp.where(pair_lane, abs2_p, abs2_t)
        lg = jnp.log(jnp.sqrt(packed) + epsilon)
        # log|t_k| sits on the lane the original shift-1 roll pairs with log|p_k|.
        d = lg - pltpu.roll(lg, 1, 1)
        d2 = jnp.where(pair_lane, d * d, 0.0)
        if mask_rows:
            row_iota = jax.lax.broadcasted_iota(jnp.int32, (tile_rows, 1), 0)
            d2 = jnp.where(row_iota < last_rows, d2, 0.0)
        # Vreg-shaped partial accumulation (layout-preserving sublane split + VPU adds).
        o_ref[...] += jnp.sum(d2.reshape(-1, _SUBLANES, _LANES), axis=0)

    aligned = last_rows == tile_rows
    if aligned and not has_dup:
        accumulate(False)                           # every block is full & real
    elif aligned:
        @pl.when(block_idx < nblocks)               # skip clamped-duplicate compute
        def _():
            accumulate(False)
    else:
        @pl.when(block_idx < nblocks - 1)           # interior: unmasked fast path
        def _():
            accumulate(False)

        @pl.when(block_idx == nblocks - 1)          # the single partial last block
        def _():
            accumulate(True)


def _round_up(x, m):
    return ((x + m - 1) // m) * m


def _row_align(dtype):
    # Sublane packing of the block's second-minor dim: 8 (f32), 16 (bf16/f16).
    return 8 * max(1, 4 // jnp.dtype(dtype).itemsize)


def _stream_dtype(x):
    # Stream f32 / bf16 / f16 natively (cast happens in-kernel); anything else
    # (e.g. f64) is cast up front.
    if x.dtype in (jnp.dtype(jnp.float32), jnp.dtype(jnp.bfloat16),
                   jnp.dtype(jnp.float16)):
        return x
    return x.astype(jnp.float32)


def log_l2_loss(y_pred, y_true, epsilon):
    """y_pred, y_true: float arrays with trailing dim == 2 (real, imag)."""
    assert y_pred.shape == y_true.shape and y_pred.shape[-1] == 2

    total = y_pred.size                 # scalar count (= 2 * complex element count)
    n_complex = total // 2
    eps = float(epsilon)                # baked as a compile-time constant

    p = _stream_dtype(y_pred).reshape(-1)   # free reshape for contiguous inputs
    t = _stream_dtype(y_true).reshape(-1)

    body_len = (total // _LANES) * _LANES   # lane-aligned prefix (even, so no split pair)
    rem = total - body_len                  # < 128 leftover scalars (even)

    tail_sum = jnp.float32(0.0)
    if rem:
        # Tiny wrapper-side tail (< 64 complex elements) instead of jnp.pad-ing
        # both full arrays in HBM.
        pt = p[body_len:].astype(jnp.float32).reshape(-1, 2)
        tt = t[body_len:].astype(jnp.float32).reshape(-1, 2)
        abs_p = jnp.sqrt(jnp.sum(pt * pt, axis=-1))
        abs_t = jnp.sqrt(jnp.sum(tt * tt, axis=-1))
        dtail = jnp.log(abs_p + eps) - jnp.log(abs_t + eps)
        tail_sum = jnp.sum(dtail * dtail)

    if body_len == 0:
        return tail_sum / jnp.float32(n_complex)

    rows = body_len // _LANES
    if rem:
        # TODO(synk): rare ragged path still copies the aligned prefix once (XLA
        # slice); the common lane-aligned case below is a zero-copy reshape.
        p_body, t_body = p[:body_len], t[:body_len]
    else:
        p_body, t_body = p, t
    p2 = p_body.reshape(rows, _LANES)
    t2 = t_body.reshape(rows, _LANES)

    row_align = max(_row_align(p2.dtype), _row_align(t2.dtype))
    tile_rows = min(_MAX_TILE_ROWS, _round_up(rows, row_align))
    nblocks = pl.cdiv(rows, tile_rows)
    num_par = 2 if nblocks >= 2 else 1       # shard blocks across v7x's two TCs
    steps = pl.cdiv(nblocks, num_par)
    has_dup = num_par * steps > nblocks      # odd split -> one clamped duplicate step
    last_rows = rows - (nblocks - 1) * tile_rows

    def in_map(c, i):
        # Clamp so the (at most one) extra step of an odd split never issues a
        # fully out-of-bounds DMA; its compute is skipped in-kernel.
        return (jnp.minimum(c * steps + i, nblocks - 1), 0)

    in_spec = pl.BlockSpec((tile_rows, _LANES), in_map)
    out_spec = pl.BlockSpec((_SUBLANES, _LANES), lambda c, i: (c, 0))

    kernel = functools.partial(
        _log_l2_kernel, epsilon=eps, tile_rows=tile_rows, nblocks=nblocks,
        steps=steps, last_rows=last_rows, has_dup=has_dup)

    in_bytes = p2.size * p2.dtype.itemsize + t2.size * t2.dtype.itemsize
    cost = pl.CostEstimate(
        flops=10 * body_len,
        transcendentals=2 * body_len,        # one sqrt + one log over packed lanes
        bytes_accessed=in_bytes + num_par * _SUBLANES * _LANES * 4)

    partials = pl.pallas_call(
        kernel,
        out_shape=jax.ShapeDtypeStruct((num_par * _SUBLANES, _LANES), jnp.float32),
        grid_spec=pltpu.PrefetchScalarGridSpec(
            num_scalar_prefetch=0,
            grid=(num_par, steps),
            in_specs=[in_spec, in_spec],
            out_specs=out_spec,
        ),
        # TODO(synk): if an xprof trace shows v7x not splitting the leading axis
        # across its two TensorCores, switch that axis to pltpu.CORE_PARALLEL.
        compiler_params=pltpu.CompilerParams(
            dimension_semantics=("parallel", "arbitrary"),
            vmem_limit_bytes=32 * 1024 * 1024),
        cost_estimate=cost,
    )(p2, t2)

    # Tiny final reduce + mean in the wrapper (one-off XLA reduce over <=2 KiB).
    return (jnp.sum(partials) + tail_sum) / jnp.float32(n_complex)


def _reference(y_pred, y_true, epsilon):
    yp = y_pred.astype(jnp.float32)
    yt = y_true.astype(jnp.float32)
    abs_p = jnp.sqrt(jnp.sum(yp * yp, axis=-1))
    abs_t = jnp.sqrt(jnp.sum(yt * yt, axis=-1))
    d = jnp.log(abs_p + epsilon) - jnp.log(abs_t + epsilon)
    return jnp.mean(d * d)


if __name__ == "__main__":
    epsilon = 1e-3
    key = jax.random.PRNGKey(0)

    # (batch, coils, H, W, complex=2) cases:
    #  - lane-aligned single block (f32)
    #  - two blocks across the parallel axis with a partial last block (f32)
    #  - odd block count: exercises the clamped-duplicate guard (f32)
    #  - ragged flat length: wrapper tail path + in-kernel row mask (f32)
    #  - bf16 inputs: native-dtype stream + in-kernel f32 cast
    cases = [
        ((2, 4, 16, 16, 2), jnp.float32),
        ((4, 8, 96, 96, 2), jnp.float32),
        ((4, 8, 144, 144, 2), jnp.float32),
        ((3, 5, 7, 9, 2), jnp.float32),
        ((2, 4, 32, 32, 2), jnp.bfloat16),
    ]
    for shape, dtype in cases:
        key, k1, k2 = jax.random.split(key, 3)
        y_pred = jax.random.normal(k1, shape, dtype=jnp.float32).astype(dtype)
        y_true = jax.random.normal(k2, shape, dtype=jnp.float32).astype(dtype)

        loss = jax.block_until_ready(log_l2_loss(y_pred, y_true, epsilon))
        ref = _reference(y_pred, y_true, epsilon)
        assert jnp.allclose(loss, ref, rtol=1e-4, atol=1e-6), (shape, dtype, loss, ref)

    print("KERNEL_OK")
</pallas_src>

<mosaic_0001>
module attributes {stable_mosaic.version = 11 : i64} {
  func.func @_log_l2_kernel(%arg0: i32, %arg1: i32, %arg2: memref<32x128xf32, #tpu.memory_space<vmem>>, %arg3: memref<32x128xf32, #tpu.memory_space<vmem>>, %arg4: memref<8x128xf32, #tpu.memory_space<vmem>>) attributes {dimension_semantics = [#tpu.dimension_semantics<parallel>, #tpu.dimension_semantics<arbitrary>], iteration_bounds = array<i64: 1, 1>, scalar_prefetch = 0 : i64, scratch_operands = 0 : i64, tpu.core_type = #tpu.core_type<tc>, window_params = [{transform_indices = @transform_0, window_bounds = array<i64: 32, 128>}, {transform_indices = @transform_1, window_bounds = array<i64: 32, 128>}, {transform_indices = @transform_2, window_bounds = array<i64: 8, 128>}]} {
    %c0_i32 = arith.constant 0 : i32
    %0 = arith.cmpi eq, %arg1, %c0_i32 : i32
    %1 = arith.extui %0 : i1 to i32
    %c0_i32_0 = arith.constant 0 : i32
    %2 = arith.cmpi ne, %1, %c0_i32_0 : i32
    scf.if %2 {
      %cst_13 = arith.constant 0.000000e+00 : f32
      %37 = vector.broadcast %cst_13 : f32 to vector<8x128xf32>
      %c0_14 = arith.constant 0 : index
      %c0_15 = arith.constant 0 : index
      %38 = vector.load %arg4[%c0_14, %c0_15] : memref<8x128xf32, #tpu.memory_space<vmem>>, vector<8x128xf32>
      tpu.vector_store %arg4[%c0_14, %c0_15], %37 {strides = array<i32>} : memref<8x128xf32, #tpu.memory_space<vmem>>, vector<8x128xf32>,
    } else {
    }
    %3 = tpu.iota {dimensions = array<i32: 1>} : vector<8x128xi32>
    %c1_i32 = arith.constant 1 : i32
    %4 = tpu.dynamic_rotate %3 by %c1_i32 dim 1 : vector<8x128xi32>, i32 -> vector<8x128xi32>
    %5 = vector.extract_strided_slice %4 {offsets = [0, 0], sizes = [1, 128], strides = [1, 1]} : vector<8x128xi32> to vector<1x128xi32>
    %6 = vector.extract_strided_slice %3 {offsets = [0, 0], sizes = [1, 128], strides = [1, 1]} : vector<8x128xi32> to vector<1x128xi32>
    %c1_i32_1 = arith.constant 1 : i32
    %7 = vector.broadcast %c1_i32_1 : i32 to vector<1x128xi32>
    %8 = arith.xori %6, %7 : vector<1x128xi32>
    %9 = arith.cmpi eq, %5, %8 : vector<1x128xi32>
    %c0 = arith.constant 0 : index
    %c0_2 = arith.constant 0 : index
    %10 = vector.load %arg2[%c0, %c0_2] : memref<32x128xf32, #tpu.memory_space<vmem>>, vector<32x128xf32>
    %c0_3 = arith.constant 0 : index
    %c0_4 = arith.constant 0 : index
    %11 = vector.load %arg3[%c0_3, %c0_4] : memref<32x128xf32, #tpu.memory_space<vmem>>, vector<32x128xf32>
    %12 = arith.mulf %10, %10 : vector<32x128xf32>
    %13 = arith.mulf %11, %11 : vector<32x128xf32>
    %c1_i32_5 = arith.constant 1 : i32
    %14 = tpu.dynamic_rotate %12 by %c1_i32_5 dim 1 : vector<32x128xf32>, i32 -> vector<32x128xf32>
    %15 = arith.addf %12, %14 : vector<32x128xf32>
    %c127_i32 = arith.constant 127 : i32
    %16 = tpu.dynamic_rotate %13 by %c127_i32 dim 1 : vector<32x128xf32>, i32 -> vector<32x128xf32>
    %17 = arith.addf %13, %16 : vector<32x128xf32>
    %18 = vector.shape_cast %9 : vector<1x128xi1> to vector<1x128xi1>
    %19 = vector.broadcast %18 : vector<1x128xi1> to vector<32x128xi1>
    %20 = arith.select %19, %15, %17 : vector<32x128xi1>, vector<32x128xf32>
    %21 = math.sqrt %20 : vector<32x128xf32>
    %cst = arith.constant 1.000000e-03 : f32
    %22 = vector.broadcast %cst : f32 to vector<32x128xf32>
    %23 = arith.addf %21, %22 : vector<32x128xf32>
    %24 = math.log %23 : vector<32x128xf32>
    %c1_i32_6 = arith.constant 1 : i32
    %25 = tpu.dynamic_rotate %24 by %c1_i32_6 dim 1 : vector<32x128xf32>, i32 -> vector<32x128xf32>
    %26 = arith.subf %24, %25 : vector<32x128xf32>
    %27 = arith.mulf %26, %26 : vector<32x128xf32>
    %cst_7 = arith.constant 0.000000e+00 : f32
    %28 = vector.shape_cast %9 : vector<1x128xi1> to vector<1x128xi1>
    %29 = vector.broadcast %28 : vector<1x128xi1> to vector<32x128xi1>
    %30 = vector.broadcast %cst_7 : f32 to vector<32x128xf32>
    %31 = arith.select %29, %27, %30 : vector<32x128xi1>, vector<32x128xf32>
    %c0_8 = arith.constant 0 : index
    %c0_9 = arith.constant 0 : index
    %32 = vector.load %arg4[%c0_8, %c0_9] : memref<8x128xf32, #tpu.memory_space<vmem>>, vector<8x128xf32>
    %33 = vector.shape_cast %31 : vector<32x128xf32> to vector<4x8x128xf32>
    %cst_10 = arith.constant dense<0.000000e+00> : vector<8x128xf32>
    %34 = vector.multi_reduction <add>, %33, %cst_10 [0] : vector<4x8x128xf32> to vector<8x128xf32>
    %35 = arith.addf %32, %34 : vector<8x128xf32>
    %c0_11 = arith.constant 0 : index
    %c0_12 = arith.constant 0 : index
    %36 = vector.load %arg4[%c0_11, %c0_12] : memref<8x128xf32, #tpu.memory_space<vmem>>, vector<8x128xf32>
    tpu.vector_store %arg4[%c0_11, %c0_12], %35 {strides = array<i32>} : memref<8x128xf32, #tpu.memory_space<vmem>>, vector<8x128xf32>,
    return
  }
  func.func @transform_0(%arg0: i32, %arg1: i32) -> (i32, i32) {
    %c1_i32 = arith.constant 1 : i32
    %0 = arith.muli %arg0, %c1_i32 : i32
    %1 = arith.addi %0, %arg1 : i32
    %c0_i32 = arith.constant 0 : i32
    %2 = arith.minsi %1, %c0_i32 : i32
    %c0_i32_0 = arith.constant 0 : i32
    %c0_i32_1 = arith.constant 0 : i32
    return %2, %c0_i32_0 : i32, i32
  }
  func.func @transform_1(%arg0: i32, %arg1: i32) -> (i32, i32) {
    %c1_i32 = arith.constant 1 : i32
    %0 = arith.muli %arg0, %c1_i32 : i32
    %1 = arith.addi %0, %arg1 : i32
    %c0_i32 = arith.constant 0 : i32
    %2 = arith.minsi %1, %c0_i32 : i32
    %c0_i32_0 = arith.constant 0 : i32
    %c0_i32_1 = arith.constant 0 : i32
    return %2, %c0_i32_0 : i32, i32
  }
  func.func @transform_2(%arg0: i32, %arg1: i32) -> (i32, i32) {
    %c0_i32 = arith.constant 0 : i32
    %c0_i32_0 = arith.constant 0 : i32
    return %arg0, %c0_i32 : i32, i32
  }
}

</mosaic_0001>

<bundles_post_ra>
// kernel: tpu_custom_call.1
= control target key start
LH: loop header
LB: loop body
LE: loop exit
PB: predicated region body
PF: predicated region fallthrough
CT: control target
= control target key end

     0   :  { %7 = vsyncpa [#allocation3], 0  ;;  %s394_s0 = inlined_call_operand.hbm [shape: f32[32,128], index: 0, kind: input, shape index: {}]   ;;  %s395_s1 = inlined_call_operand.hbm [shape: f32[32,128], index: 1, kind: input, shape index: {}]   ;;  %s396_s2 = inlined_call_operand.hbm [shape: f32[8,128], index: 2, kind: output, shape index: {}]  }
   0x1   :  { %8 = vsyncpa [#allocation6], 0 }
   0x2   :  { %9 = vsyncpa [#allocation4], 0  ;;  %s20_s11 = sshll.u32 %s394_s0, 4  ;;  %s333_s12 = smov [#allocation2]   ;;  %s21_s11 = int_to_ptr.hbm [resolvable:$true] %s20_s11 }
   0x3   :  { %s22_s13 = sshll.u32 %s333_s12, 4  ;;  %s39_s16 = sshll.u32 %s395_s1, 4  ;;  %s23_s13 = int_to_ptr.vmem [resolvable:$true] %s22_s13  ;;  %s40_s16 = int_to_ptr.hbm [resolvable:$true] %s39_s16 }
   0x4   :  { %s334_s17 = smov 128   ;;  %s335_s18 = smov 8  }
   0x5   :  { %28 = dma.hbm_to_vmem [thread:$0]  %s21_s11, 512, %s23_s13, [#allocation3], %s334_s17, %s334_s17, %s335_s18  }
   0x6   :  { %s336_s19 = smov [#allocation5]  }
   0x7   :  { %s41_s20 = sshll.u32 %s336_s19, 4  ;;  %s42_s20 = int_to_ptr.vmem [resolvable:$true] %s41_s20 }
   0x8   :  { %47 = dma.hbm_to_vmem [thread:$0]  %s40_s16, 512, %s42_s20, [#allocation6], %s334_s17, %s334_s17, %s335_s18  }
   0x9   :  { %327 = dma.done.wait [#allocation3], 512  }
   0xa   :  { %328 = vsyncadd [#allocation3], 4294966784 }
   0xb   :  { %329 = dma.done.wait [#allocation6], 512  }
   0xc   :  { %330 = vsyncadd [#allocation6], 4294966784  ;;  %v69_v0 = vlaneseq  ;;  %s337_s0 = smov 1   ;;  %v76_v2 = vld [vmem:[#allocation2 + $0x8] sm:$0xff]  ;;  %v75_v3 = vld [vmem:[#allocation2] sm:$0xff]  ;;  %s338_s1 = smov 127  }
   0xd   :  { %v84_v4 = vmul.f32 %v76_v2, %v76_v2  ;;  %v83_v5 = vmul.f32 %v75_v3, %v75_v3  ;;  %v80_v6 = vld [vmem:[#allocation5 + $0x8] sm:$0xff]  ;;  %v79_v8 = vld [vmem:[#allocation5] sm:$0xff]  ;;  %v77_v9 = vld [vmem:[#allocation2 + $0x10] sm:$0xff]  ;;  %v339_v21 = vmov 0   ;;  %s340_s21 = smov [#allocation7]   ;;  %s215_s25 = sshll.u32 %s396_s2, 4  ;;  %s216_s25 = int_to_ptr.hbm [resolvable:$true] %s215_s25 }
   0xe   :  { %v70_v1 = vand.u32 127, %v69_v0  ;;  %v88_v7 = vmul.f32 %v80_v6, %v80_v6  ;;  %v81_v10 = vld [vmem:[#allocation5 + $0x10] sm:$0xff]  ;;  %v87_v11 = vmul.f32 %v79_v8, %v79_v8  ;;  %v85_v12 = vmul.f32 %v77_v9, %v77_v9  ;;  %v78_v14 = vld [vmem:[#allocation2 + $0x18] sm:$0xff]  ;;  %s213_s22 = sshll.u32 %s340_s21, 4  ;;  %s214_s22 = int_to_ptr.vmem [resolvable:$true] %s213_s22 }
   0xf   :  { %93 = vrot.lane.b32.xlu1 %v84_v4, %s337_s0  ;;  %v89_v13 = vmul.f32 %v81_v10, %v81_v10  ;;  %v82_v15 = vld [vmem:[#allocation5 + $0x18] sm:$0xff]  ;;  %v86_v16 = vmul.f32 %v78_v14, %v78_v14 }
  0x10   :  { %71 = vrot.lane.b32.xlu0 %v70_v1, %s337_s0  ;;  %105 = vrot.lane.b32.xlu2 %v88_v7, %s338_s1  ;;  %v90_v17 = vmul.f32 %v82_v15, %v82_v15  ;;  %v73_v18 = vxor.u32 1, %v70_v1 }
  0x17   :  { %103 = vrot.lane.b32.xlu1 %v87_v11, %s338_s1 }
  0x18   :  { %91 = vrot.lane.b32.xlu0 %v83_v5, %s337_s0  ;;  %95 = vrot.lane.b32.xlu2 %v85_v12, %s337_s0 }
  0x1f   :  { %97 = vrot.lane.b32.xlu1 %v86_v16, %s337_s0 }
  0x20   :  { %107 = vrot.lane.b32.xlu0 %v89_v13, %s338_s1  ;;  %109 = vrot.lane.b32.xlu2 %v90_v17, %s338_s1 }
  0x6a   :  { %v106_v19 = vpop.permute.xlu2 %105 }
  0x6b   :  { %v112_v24 = vadd.f32 %v106_v19, %v88_v7 }
  0x72   :  { %v96_v29 = vpop.permute.xlu2 %95 }
  0x73   :  { %v101_v37 = vadd.f32 %v96_v29, %v85_v12 }
  0x7a   :  { %v110_v40 = vpop.permute.xlu2 %109 }
  0x7b   :  { %v114_v43 = vadd.f32 %v110_v40, %v90_v17 }
  0x81   :  { %v94_v26 = vpop.permute.xlu1 %93 }
  0x82   :  { %v72_v20 = vpop.permute.xlu0 %71  ;;  %v100_v27 = vadd.f32 %v94_v26, %v84_v4 }
  0x83   :  { %vm74_vm0 = vcmp.eq.s32.totalorder %v72_v20, %v73_v18 }
  0x84   :  { %v115_v22 = vsel %vm74_vm0, 1, %v339_v21 }
  0x85   :  { %v116_v23 = vperm.slane %v115_v22, 0 }
  0x87   :  { %vm367_vm1 = vcmp.eq.s32.totalorder %v116_v23, 1 }
  0x88   :  { %v119_v30 = vsel %vm367_vm1, %v100_v27, %v112_v24 }
  0x89   :  { %239 = vrsqrt.f32 %v119_v30  ;;  %v104_v32 = vpop.permute.xlu1 %103  ;;  %vm141_vm2 = vcmp.eq.f32.partialorder %v119_v30, inf  ;;  %v144_v56 = vand.u32 2147483648, %v119_v30  ;;  %vm143_vm3 = vcmp.eq.f32.partialorder %v119_v30, 0.0 }
  0x8a   :  { %v92_v28 = vpop.permute.xlu0 %91  ;;  %v111_v33 = vadd.f32 %v104_v32, %v87_v11 }
  0x8b   :  { %v99_v31 = vadd.f32 %v92_v28, %v83_v5 }
  0x8d   :  { %v118_v38 = vsel %vm367_vm1, %v99_v31, %v111_v33 }
  0x8e   :  { %241 = vrsqrt.f32 %v118_v38  ;;  %vm129_vm4 = vcmp.eq.f32.partialorder %v118_v38, inf  ;;  %v132_v7 = vand.u32 2147483648, %v118_v38  ;;  %vm131_vm5 = vcmp.eq.f32.partialorder %v118_v38, 0.0 }
  0x8f   :  { %v240_v34 = vpop.eup %239 }
  0x90   :  { %v135_v36 = vmul.f32 %v240_v34, %v119_v30 }
  0x91   :  { %v98_v45 = vpop.permute.xlu1 %97 }
  0x92   :  { %v108_v35 = vpop.permute.xlu0 %107  ;;  %v136_v42 = vmul.f32 %v240_v34, %v135_v36  ;;  %v102_v46 = vadd.f32 %v98_v45, %v86_v16 }
  0x93   :  { %v113_v39 = vadd.f32 %v108_v35, %v89_v13 }
  0x94   :  { %v137_v44 = vmul.f32 0.5, %v136_v42  ;;  %v242_v48 = vpop.eup %241  ;;  %v121_v50 = vsel %vm367_vm1, %v102_v46, %v114_v43 }
  0x95   :  { %v120_v41 = vsel %vm367_vm1, %v101_v37, %v113_v39  ;;  %v123_v49 = vmul.f32 %v242_v48, %v118_v38  ;;  %vm165_vm8 = vcmp.eq.f32.partialorder %v121_v50, inf  ;;  %v168_v22 = vand.u32 2147483648, %v121_v50 }
  0x96   :  { %243 = vrsqrt.f32 %v120_v41  ;;  %v138_v47 = vsub.f32 1.5, %v137_v44  ;;  %vm153_vm6 = vcmp.eq.f32.partialorder %v120_v41, inf  ;;  %v156_v12 = vand.u32 2147483648, %v120_v41 }
  0x97   :  { %245 = vrsqrt.f32 %v121_v50  ;;  %v124_v55 = vmul.f32 %v242_v48, %v123_v49  ;;  %vm155_vm7 = vcmp.eq.f32.partialorder %v120_v41, 0.0  ;;  %vm167_vm9 = vcmp.eq.f32.partialorder %v121_v50, 0.0 }
  0x98   :  { %v139_v51 = vmul.f32 %v240_v34, %v138_v47 }
  0x99   :  { %v125_v58 = vmul.f32 0.5, %v124_v55 }
  0x9a   :  { %v140_v54 = vmul.f32 %v139_v51, %v119_v30 }
  0x9b   :  { %v126_v62 = vsub.f32 1.5, %v125_v58 }
  0x9c   :  { %v244_v52 = vpop.eup %243  ;;  %v142_v57 = vsel %vm141_vm2, %v119_v30, %v140_v54 }
  0x9d   :  { %v147_v53 = vmul.f32 %v244_v52, %v120_v41  ;;  %v145_v60 = vsel %vm143_vm3, %v144_v56, %v142_v57  ;;  %v246_v0 = vpop.eup %245  ;;  %v127_v2 = vmul.f32 %v242_v48, %v126_v62 }
  0x9e   :  { %v171_v61 = vadd.f32 0.001, %v145_v60  ;;  %v159_v1 = vmul.f32 %v246_v0, %v121_v50 }
  0x9f   :  { %v148_v59 = vmul.f32 %v244_v52, %v147_v53  ;;  %v128_v4 = vmul.f32 %v127_v2, %v118_v38 }
  0xa0   :  { %247 = vlog2.f32 %v171_v61  ;;  %v160_v6 = vmul.f32 %v246_v0, %v159_v1 }
  0xa1   :  { %v149_v63 = vmul.f32 0.5, %v148_v59  ;;  %v130_v8 = vsel %vm129_vm4, %v118_v38, %v128_v4 }
  0xa2   :  { %v161_v10 = vmul.f32 0.5, %v160_v6  ;;  %v133_v11 = vsel %vm131_vm5, %v132_v7, %v130_v8 }
  0xa3   :  { %v150_v3 = vsub.f32 1.5, %v149_v63  ;;  %v170_v14 = vadd.f32 0.001, %v133_v11 }
  0xa4   :  { %v162_v16 = vsub.f32 1.5, %v161_v10 }
  0xa5   :  { %v151_v5 = vmul.f32 %v244_v52, %v150_v3  ;;  %249 = vlog2.f32 %v170_v14 }
  0xa6   :  { %v248_v13 = vpop.eup %247  ;;  %v163_v20 = vmul.f32 %v246_v0, %v162_v16 }
  0xa7   :  { %v152_v9 = vmul.f32 %v151_v5, %v120_v41  ;;  %v177_v17 = vmul.f32 0.6931472, %v248_v13 }
  0xa8   :  { %v164_v21 = vmul.f32 %v163_v20, %v121_v50 }
  0xa9   :  { %v154_v15 = vsel %vm153_vm6, %v120_v41, %v152_v9  ;;  %184 = vrot.lane.b32.xlu1 %v177_v17, %s337_s0 }
  0xaa   :  { %v157_v18 = vsel %vm155_vm7, %v156_v12, %v154_v15  ;;  %v166_v23 = vsel %vm165_vm8, %v121_v50, %v164_v21 }
  0xab   :  { %v172_v19 = vadd.f32 0.001, %v157_v18  ;;  %v169_v24 = vsel %vm167_vm9, %v168_v22, %v166_v23  ;;  %v250_v26 = vpop.eup %249 }
  0xac   :  { %v173_v27 = vadd.f32 0.001, %v169_v24  ;;  %v175_v28 = vmul.f32 0.6931472, %v250_v26 }
  0xad   :  { %251 = vlog2.f32 %v172_v19 }
  0xae   :  { %253 = vlog2.f32 %v173_v27  ;;  %182 = vrot.lane.b32.xlu0 %v175_v28, %s337_s0 }
  0xb3   :  { %v252_v29 = vpop.eup %251 }
  0xb4   :  { %v179_v30 = vmul.f32 0.6931472, %v252_v29  ;;  %v254_v31 = vpop.eup %253 }
  0xb5   :  { %v181_v32 = vmul.f32 0.6931472, %v254_v31 }
  0xb6   :  { %186 = vrot.lane.b32.xlu2 %v179_v30, %s337_s0 }
  0xb7   :  { %188 = vrot.lane.b32.xlu0 %v181_v32, %s337_s0 }
 0x110   :  { %v187_v35 = vpop.permute.xlu2 %186 }
 0x111   :  { %v192_v38 = vsub.f32 %v179_v30, %v187_v35 }
 0x113   :  { %v196_v42 = vmul.f32 %v192_v38, %v192_v38 }
 0x115   :  { %v200_v47 = vsel %vm367_vm1, %v196_v42, 0.0 }
 0x11b   :  { %v185_v33 = vpop.permute.xlu1 %184 }
 0x11c   :  { %v191_v34 = vsub.f32 %v177_v17, %v185_v33 }
 0x11e   :  { %v195_v39 = vmul.f32 %v191_v34, %v191_v34 }
 0x120   :  { %v183_v36 = vpop.permute.xlu0 %182  ;;  %v199_v43 = vsel %vm367_vm1, %v195_v39, 0.0 }
 0x121   :  { %v190_v37 = vsub.f32 %v175_v28, %v183_v36 }
 0x123   :  { %v194_v40 = vmul.f32 %v190_v37, %v190_v37 }
 0x125   :  { %v198_v41 = vsel %vm367_vm1, %v194_v40, 0.0 }
 0x126   :  { %v203_v44 = vadd.f32 %v199_v43, %v198_v41 }
 0x128   :  { %v204_v49 = vadd.f32 %v203_v44, %v200_v47 }
 0x129   :  { %v189_v45 = vpop.permute.xlu0 %188 }
 0x12a   :  { %v193_v46 = vsub.f32 %v181_v32, %v189_v45 }
 0x12c   :  { %v197_v48 = vmul.f32 %v193_v46, %v193_v46 }
 0x12e   :  { %v201_v50 = vsel %vm367_vm1, %v197_v48, 0.0 }
 0x12f   :  { %v205_v51 = vadd.f32 %v204_v49, %v201_v50 }
 0x131   :  { %207 = vst [vmem:[#allocation7] sm:$0xff] %v205_v51 }
 0x132   :  { %218 = dma.vmem_to_hbm [thread:$0]  %s214_s22, 128, %s216_s25, [#allocation4]  }
 0x133   :  { %331 = dma.done.wait [#allocation4], 128  }
 0x134   :  { %332 = vsyncadd [#allocation4], 4294967168 }
 0x135   :  { %223 = vsyncpa [#allocation3], 1 }
 0x136   :  { %224 = vsyncpa [#allocation6], 1 }
 0x137   :  { %225 = vsyncpa [#allocation4], 1 }

</bundles_post_ra>
